<compile_context>
chip_gen: v6e
topology: v6e:2x2x1
jax: 0.10.0
libtpu: 0.0.40
codegen_flags: <defaults>
</compile_context>

<pallas_src>
import jax
import jax.numpy as jnp
from jax import lax
from jax.experimental import pallas as pl
from jax.experimental.pallas import tpu as pltpu


def bigram_kernel(tok_ref, emb_ref, w_ref, b_ref, out_ref):
    # tok_ref : (TILE_N, 1) int32 token ids for this row tile
    # emb_ref : (V, H) f32 embedding table (constant block -> VMEM resident)
    # w_ref   : (V, H) f32 linear weight, PyTorch layout (contracted on H)
    # b_ref   : (1, V) f32 bias
    # out_ref : (TILE_N, V) f32 logits tile
    tile_n, v = out_ref.shape

    tok = tok_ref[...]                                        # (TILE_N, 1) i32
    col = lax.broadcasted_iota(jnp.int32, (tile_n, v), 1)     # (TILE_N, V)
    onehot = (col == tok).astype(jnp.float32)                 # (TILE_N, V)

    # Embedding gather as one MXU matmul: (TILE_N, V) @ (V, H) -> (TILE_N, H)
    emb = jnp.dot(onehot, emb_ref[...], preferred_element_type=jnp.float32)

    # Linear: contract on H against (V, H) weight -> (TILE_N, V), add bias.
    logits = lax.dot_general(
        emb, w_ref[...],
        dimension_numbers=(((1,), (1,)), ((), ())),
        preferred_element_type=jnp.float32,
    )
    out_ref[...] = logits + b_ref[...]


def _round_up(x, m):
    return ((x + m - 1) // m) * m


@jax.jit
def bigram_forward(tokens, emb_table, weight, bias):
    """tokens: (B, T) int; emb_table: (V, H); weight: (V, H); bias: (V,)."""
    B, T = tokens.shape
    V, H = emb_table.shape
    N = B * T

    # Row tile: multiple of 8 sublanes, capped at 128; pad N so no tail drops.
    TILE_N = min(128, _round_up(N, 8))
    N_pad = _round_up(N, TILE_N)

    # Clamp ids (PyTorch would raise on OOR; here OOR would just give a zero
    # one-hot row — clamp keeps semantics tight).  All of this fuses under jit.
    tok = jnp.clip(tokens.reshape(N).astype(jnp.int32), 0, V - 1)
    tok = jnp.pad(tok, (0, N_pad - N)).reshape(N_pad, 1)

    out = pl.pallas_call(
        bigram_kernel,
        out_shape=jax.ShapeDtypeStruct((N_pad, V), jnp.float32),
        grid_spec=pltpu.PrefetchScalarGridSpec(
            num_scalar_prefetch=0,
            grid=(N_pad // TILE_N,),
            in_specs=[
                pl.BlockSpec((TILE_N, 1), lambda i: (i, 0)),   # token ids
                pl.BlockSpec((V, H), lambda i: (0, 0)),        # emb (resident)
                pl.BlockSpec((V, H), lambda i: (0, 0)),        # weight (resident)
                pl.BlockSpec((1, V), lambda i: (0, 0)),        # bias
            ],
            out_specs=pl.BlockSpec((TILE_N, V), lambda i: (i, 0)),
        ),
        compiler_params=pltpu.CompilerParams(
            dimension_semantics=("parallel",)),   # shards rows across TCs when
                                                  # the grid has >1 step (v7x)
    )(tok, emb_table, weight, bias.reshape(1, V))

    return out[:N].reshape(B, T, V)


if __name__ == "__main__":
    VOCAB = 128
    HIDDEN = 32
    B, T = 2, 8

    key = jax.random.PRNGKey(0)
    k_emb, k_w, k_b, k_tok = jax.random.split(key, 4)

    # nn.Embedding default init: N(0, 1)
    emb_table = jax.random.normal(k_emb, (VOCAB, HIDDEN), dtype=jnp.float32)
    # nn.Linear default init: U(-1/sqrt(fan_in), 1/sqrt(fan_in))
    bound = 1.0 / (HIDDEN ** 0.5)
    weight = jax.random.uniform(k_w, (VOCAB, HIDDEN), minval=-bound,
                                maxval=bound, dtype=jnp.float32)
    bias = jax.random.uniform(k_b, (VOCAB,), minval=-bound, maxval=bound,
                              dtype=jnp.float32)

    tokens = jax.random.randint(k_tok, (B, T), 0, VOCAB, dtype=jnp.int32)

    logits = bigram_forward(tokens, emb_table, weight, bias)
    jax.block_until_ready(logits)

    # Reference check (plain JAX): embedding gather -> linear.
    ref = jnp.take(emb_table, tokens, axis=0) @ weight.T + bias
    assert logits.shape == (B, T, VOCAB)
    assert jnp.allclose(logits, ref, atol=1e-4, rtol=1e-4)

    print("KERNEL_OK")
</pallas_src>

<mosaic_0001>
module attributes {stable_mosaic.version = 11 : i64} {
  func.func @bigram_kernel(%arg0: i32, %arg1: memref<16x1xi32, #tpu.memory_space<vmem>>, %arg2: memref<128x32xf32, #tpu.memory_space<vmem>>, %arg3: memref<128x32xf32, #tpu.memory_space<vmem>>, %arg4: memref<1x128xf32, #tpu.memory_space<vmem>>, %arg5: memref<16x128xf32, #tpu.memory_space<vmem>>) attributes {dimension_semantics = [#tpu.dimension_semantics<parallel>], iteration_bounds = array<i64: 1>, scalar_prefetch = 0 : i64, scratch_operands = 0 : i64, tpu.core_type = #tpu.core_type<tc>, window_params = [{transform_indices = @transform_0, window_bounds = array<i64: 16, 1>}, {pipeline_mode = #tpu.pipeline_mode<synchronous>, transform_indices = @transform_1, window_bounds = array<i64: 128, 32>}, {pipeline_mode = #tpu.pipeline_mode<synchronous>, transform_indices = @transform_2, window_bounds = array<i64: 128, 32>}, {pipeline_mode = #tpu.pipeline_mode<synchronous>, transform_indices = @transform_3, window_bounds = array<i64: 1, 128>}, {transform_indices = @transform_4, window_bounds = array<i64: 16, 128>}]} {
    %c0 = arith.constant 0 : index
    %c0_0 = arith.constant 0 : index
    %0 = vector.load %arg1[%c0, %c0_0] : memref<16x1xi32, #tpu.memory_space<vmem>>, vector<16x1xi32>
    %1 = tpu.iota {dimensions = array<i32: 1>} : vector<16x128xi32>
    %2 = vector.broadcast %0 : vector<16x1xi32> to vector<16x128xi32>
    %3 = arith.cmpi eq, %1, %2 : vector<16x128xi32>
    %4 = arith.extui %3 : vector<16x128xi1> to vector<16x128xi32>
    %5 = arith.sitofp %4 : vector<16x128xi32> to vector<16x128xf32>
    %c0_1 = arith.constant 0 : index
    %c0_2 = arith.constant 0 : index
    %6 = vector.load %arg2[%c0_1, %c0_2] : memref<128x32xf32, #tpu.memory_space<vmem>>, vector<128x32xf32>
    %cst = arith.constant dense<0.000000e+00> : vector<16x32xf32>
    %7 = tpu.matmul %5, %6, %cst {dimension_numbers = #tpu.dot_dimension_numbers<[1], [0], [0], [1], [0, 0, 1, 1], [], []>} : vector<16x128xf32>, vector<128x32xf32>, vector<16x32xf32> -> vector<16x32xf32>
    %c0_3 = arith.constant 0 : index
    %c0_4 = arith.constant 0 : index
    %8 = vector.load %arg3[%c0_3, %c0_4] : memref<128x32xf32, #tpu.memory_space<vmem>>, vector<128x32xf32>
    %cst_5 = arith.constant dense<0.000000e+00> : vector<16x128xf32>
    %9 = tpu.matmul %7, %8, %cst_5 {dimension_numbers = #tpu.dot_dimension_numbers<[1], [1], [0], [0], [0, 0, 1, 0], [], []>} : vector<16x32xf32>, vector<128x32xf32>, vector<16x128xf32> -> vector<16x128xf32>
    %c0_6 = arith.constant 0 : index
    %c0_7 = arith.constant 0 : index
    %10 = vector.load %arg4[%c0_6, %c0_7] : memref<1x128xf32, #tpu.memory_space<vmem>>, vector<1x128xf32>
    %11 = vector.broadcast %10 : vector<1x128xf32> to vector<16x128xf32>
    %12 = arith.addf %9, %11 : vector<16x128xf32>
    %c0_8 = arith.constant 0 : index
    %c0_9 = arith.constant 0 : index
    %13 = vector.load %arg5[%c0_8, %c0_9] : memref<16x128xf32, #tpu.memory_space<vmem>>, vector<16x128xf32>
    tpu.vector_store %arg5[%c0_8, %c0_9], %12 {strides = array<i32>} : memref<16x128xf32, #tpu.memory_space<vmem>>, vector<16x128xf32>,
    return
  }
  func.func @transform_0(%arg0: i32) -> (i32, i32) {
    %c0_i32 = arith.constant 0 : i32
    %c0_i32_0 = arith.constant 0 : i32
    return %arg0, %c0_i32 : i32, i32
  }
  func.func @transform_1(%arg0: i32) -> (i32, i32) {
    %c0_i32 = arith.constant 0 : i32
    %c0_i32_0 = arith.constant 0 : i32
    %c0_i32_1 = arith.constant 0 : i32
    return %c0_i32, %c0_i32_0 : i32, i32
  }
  func.func @transform_2(%arg0: i32) -> (i32, i32) {
    %c0_i32 = arith.constant 0 : i32
    %c0_i32_0 = arith.constant 0 : i32
    %c0_i32_1 = arith.constant 0 : i32
    return %c0_i32, %c0_i32_0 : i32, i32
  }
  func.func @transform_3(%arg0: i32) -> (i32, i32) {
    %c0_i32 = arith.constant 0 : i32
    %c0_i32_0 = arith.constant 0 : i32
    %c0_i32_1 = arith.constant 0 : i32
    return %c0_i32, %c0_i32_0 : i32, i32
  }
  func.func @transform_4(%arg0: i32) -> (i32, i32) {
    %c0_i32 = arith.constant 0 : i32
    %c0_i32_0 = arith.constant 0 : i32
    return %arg0, %c0_i32 : i32, i32
  }
}

</mosaic_0001>

<bundles_post_ra>
// kernel: bigram_forward.1
= control target key start
LH: loop header
LB: loop body
LE: loop exit
PB: predicated region body
PF: predicated region fallthrough
CT: control target
= control target key end

     0   :  { %v453_v2 = vmov 0   ;;  %vm148_vm0 = vcmask 261120   ;;  %s625_s0 = inlined_call_operand.vmem [shape: s32[16,1], index: 0, kind: input, shape index: {}]   ;;  %s626_s1 = inlined_call_operand.vmem [shape: f32[128,32], index: 1, kind: input, shape index: {}]   ;;  %s627_s2 = inlined_call_operand.vmem [shape: f32[128,32], index: 2, kind: input, shape index: {}]   ;;  %s628_s3 = inlined_call_operand.vmem [shape: f32[1,128], index: 3, kind: input, shape index: {}]   ;;  %s629_s4 = inlined_call_operand.hbm [shape: f32[16,128], index: 4, kind: output, shape index: {}]  }
   0x1   :  { %v18_v0 = vld [vmem:[%s625_s0] sm:$0xff]  ;;  %v49_v1 = vld [vmem:[%s626_s1 + $0x78] sm:$0xff]  ;;  %430 = vset.pattern.permute.xlu0 %v453_v2  ;;  %v48_v3 = vld [vmem:[%s626_s1 + $0x70] sm:$0xff] }
   0x2   :  { %355 = vmatprep.subr.mxu0 %v49_v1  ;;  %23 = vperm.xlu0 %430, %v18_v0   ;;  %v47_v4 = vld [vmem:[%s626_s1 + $0x68] sm:$0xff]  ;;  %v46_v6 = vld [vmem:[%s626_s1 + $0x60] sm:$0xff]  ;;  %v45_v7 = vld [vmem:[%s626_s1 + $0x58] sm:$0xff] }
   0x3   :  { %356 = vmatpush3.msra.mxu0 %v49_v1  ;;  %v19_v5 = vld [vmem:[%s625_s0 + $0x8] sm:$0xff]  ;;  %v140_v8 = vld [vmem:[%s627_s2 + $0x78] sm:$0xff]  ;;  %v139_v9 = vld [vmem:[%s627_s2 + $0x70] sm:$0xff] }
   0x4   :  { %357 = vmatprep.subr.mxu0 %v48_v3  ;;  %390 = vmatprep.subr.msk.mxu1 %vm148_vm0, %v140_v8  ;;  %v44_v10 = vld [vmem:[%s626_s1 + $0x50] sm:$0xff]  ;;  %v43_v11 = vld [vmem:[%s626_s1 + $0x48] sm:$0xff] }
   0x5   :  { %358 = vmatpush3.msra.mxu0 %v48_v3  ;;  %391 = vmatpush3.xpose.msk.msra.mxu1 %vm148_vm0, %v140_v8  ;;  %v138_v12 = vld [vmem:[%s627_s2 + $0x68] sm:$0xff] }
   0x6   :  { %359 = vmatprep.subr.mxu0 %v47_v4  ;;  %26 = vperm.xlu0 %430, %v19_v5  }
   0x7   :  { %360 = vmatpush3.msra.mxu0 %v47_v4  ;;  %392 = vmatprep.subr.msk.mxu1 %vm148_vm0, %v139_v9 }
   0x8   :  { %361 = vmatprep.subr.mxu0 %v46_v6 }
   0x9   :  { %362 = vmatpush3.msra.mxu0 %v46_v6 }
   0xa   :  { %363 = vmatprep.subr.mxu0 %v45_v7 }
   0xb   :  { %364 = vmatpush3.msra.mxu0 %v45_v7 }
   0xc   :  { %365 = vmatprep.subr.mxu0 %v44_v10 }
   0xd   :  { %9 = vsyncpa [#allocation3], 0  ;;  %366 = vmatpush3.msra.mxu0 %v44_v10  ;;  %v42_v13 = vld [vmem:[%s626_s1 + $0x40] sm:$0xff]  ;;  %393 = vmatpush3.xpose.msk.msra.mxu1 %vm148_vm0, %v139_v9  ;;  %v41_v14 = vld [vmem:[%s626_s1 + $0x38] sm:$0xff]  ;;  %v20_v34 = vlaneseq  ;;  %v454_v37 = vmov 1.0   ;;  %s455_s30 = smov [#allocation2]  }
   0xe   :  { %367 = vmatprep.subr.mxu0 %v43_v11  ;;  %394 = vmatprep.subr.msk.mxu1 %vm148_vm0, %v138_v12  ;;  %v137_v15 = vld [vmem:[%s627_s2 + $0x60] sm:$0xff]  ;;  %v40_v16 = vld [vmem:[%s626_s1 + $0x30] sm:$0xff]  ;;  %v39_v17 = vld [vmem:[%s626_s1 + $0x28] sm:$0xff]  ;;  %s285_s5 = sshll.u32 %s455_s30, 4  ;;  %s286_s5 = int_to_ptr.vmem [resolvable:$true] %s285_s5 }
   0xf   :  { %368 = vmatpush3.msra.mxu0 %v43_v11  ;;  %v136_v18 = vld [vmem:[%s627_s2 + $0x58] sm:$0xff]  ;;  %v38_v19 = vld [vmem:[%s626_s1 + $0x20] sm:$0xff]  ;;  %v135_v21 = vld [vmem:[%s627_s2 + $0x50] sm:$0xff]  ;;  %v21_v35 = vand.u32 127, %v20_v34  ;;  %p436_p1 = scmp.lt.s32.totalorder %s286_s5, %s286_s5 }
  0x10   :  { %369 = vmatprep.subr.mxu0 %v42_v13  ;;  %v37_v20 = vld [vmem:[%s626_s1 + $0x18] sm:$0xff]  ;;  %v36_v22 = vld [vmem:[%s626_s1 + $0x10] sm:$0xff]  ;;  %v35_v23 = vld [vmem:[%s626_s1 + $0x8] sm:$0xff] }
  0x11   :  { %370 = vmatpush3.msra.mxu0 %v42_v13  ;;  %395 = vmatpush3.xpose.msk.msra.mxu1 %vm148_vm0, %v138_v12  ;;  %v134_v24 = vld [vmem:[%s627_s2 + $0x48] sm:$0xff]  ;;  %v34_v25 = vld [vmem:[%s626_s1] sm:$0xff]  ;;  %v132_v27 = vld [vmem:[%s627_s2 + $0x38] sm:$0xff] }
  0x12   :  { %371 = vmatprep.subr.mxu0 %v41_v14  ;;  %396 = vmatprep.subr.msk.mxu1 %vm148_vm0, %v137_v15  ;;  %v133_v26 = vld [vmem:[%s627_s2 + $0x40] sm:$0xff]  ;;  %v131_v28 = vld [vmem:[%s627_s2 + $0x30] sm:$0xff]  ;;  %v130_v29 = vld [vmem:[%s627_s2 + $0x28] sm:$0xff] }
  0x13   :  { %372 = vmatpush3.msra.mxu0 %v41_v14  ;;  %v129_v30 = vld [vmem:[%s627_s2 + $0x20] sm:$0xff]  ;;  %v128_v31 = vld [vmem:[%s627_s2 + $0x18] sm:$0xff]  ;;  %v127_v32 = vld [vmem:[%s627_s2 + $0x10] sm:$0xff] }
  0x14   :  { %373 = vmatprep.subr.mxu0 %v40_v16  ;;  %v126_v33 = vld [vmem:[%s627_s2 + $0x8] sm:$0xff]  ;;  %v125_v39 = vld [vmem:[%s627_s2] sm:$0xff]  ;;  %s431_s2 = scalar_lea.vmem %s286_s5, 256 }
  0x15   :  { %374 = vmatpush3.msra.mxu0 %v40_v16  ;;  %397 = vmatpush3.xpose.msk.msra.mxu1 %vm148_vm0, %v137_v15  ;;  %v300_v42 = vld [vmem:[%s628_s3] ss:$0 sm:$0xff]  ;;  %p432_p0 = scmp.ne.s32.totalorder %s286_s5, %s431_s2  ;;  %p437_p2 = scmp.lt.s32.totalorder %s431_s2, %s431_s2 }
  0x16   :  { %375 = vmatprep.subr.mxu0 %v39_v17  ;;  %398 = vmatprep.subr.msk.mxu1 %vm148_vm0, %v136_v18 }
  0x17   :  { %376 = vmatpush3.msra.mxu0 %v39_v17  ;;  %p438_p3 = por %p437_p2, %p436_p1 }
  0x18   :  { %377 = vmatprep.subr.mxu0 %v38_v19 }
  0x19   :  { %378 = vmatpush3.msra.mxu0 %v38_v19  ;;  %399 = vmatpush3.xpose.msk.msra.mxu1 %vm148_vm0, %v136_v18  ;;  %p439_p4 = pnand %p438_p3, %p432_p0 }
  0x1a   :  { %379 = vmatprep.subr.mxu0 %v37_v20  ;;  %400 = vmatprep.subr.msk.mxu1 %vm148_vm0, %v135_v21 }
  0x1b   :  { %380 = vmatpush3.msra.mxu0 %v37_v20 }
  0x1c   :  { %381 = vmatprep.subr.mxu0 %v36_v22 }
  0x1d   :  { %382 = vmatpush3.msra.mxu0 %v36_v22  ;;  %401 = vmatpush3.xpose.msk.msra.mxu1 %vm148_vm0, %v135_v21 }
  0x1e   :  { %383 = vmatprep.subr.mxu0 %v35_v23  ;;  %402 = vmatprep.subr.msk.mxu1 %vm148_vm0, %v134_v24 }
  0x1f   :  { %384 = vmatpush3.msra.mxu0 %v35_v23 }
  0x20   :  { %385 = vmatprep.subr.mxu0 %v34_v25 }
  0x21   :  { %386 = vmatpush3.msra.mxu0 %v34_v25  ;;  %403 = vmatpush3.xpose.msk.msra.mxu1 %vm148_vm0, %v134_v24 }
  0x22   :  { %404 = vmatprep.subr.msk.mxu1 %vm148_vm0, %v133_v26 }
  0x25   :  { %405 = vmatpush3.xpose.msk.msra.mxu1 %vm148_vm0, %v133_v26 }
  0x26   :  { %406 = vmatprep.subr.msk.mxu1 %vm148_vm0, %v132_v27 }
  0x29   :  { %407 = vmatpush3.xpose.msk.msra.mxu1 %vm148_vm0, %v132_v27 }
  0x2a   :  { %408 = vmatprep.subr.msk.mxu1 %vm148_vm0, %v131_v28 }
  0x2d   :  { %409 = vmatpush3.xpose.msk.msra.mxu1 %vm148_vm0, %v131_v28 }
  0x2e   :  { %410 = vmatprep.subr.msk.mxu1 %vm148_vm0, %v130_v29 }
  0x31   :  { %411 = vmatpush3.xpose.msk.msra.mxu1 %vm148_vm0, %v130_v29 }
  0x32   :  { %412 = vmatprep.subr.msk.mxu1 %vm148_vm0, %v129_v30 }
  0x35   :  { %413 = vmatpush3.xpose.msk.msra.mxu1 %vm148_vm0, %v129_v30 }
  0x36   :  { %414 = vmatprep.subr.msk.mxu1 %vm148_vm0, %v128_v31 }
  0x39   :  { %415 = vmatpush3.xpose.msk.msra.mxu1 %vm148_vm0, %v128_v31 }
  0x3a   :  { %416 = vmatprep.subr.msk.mxu1 %vm148_vm0, %v127_v32 }
  0x3d   :  { %417 = vmatpush3.xpose.msk.msra.mxu1 %vm148_vm0, %v127_v32 }
  0x3e   :  { %418 = vmatprep.subr.msk.mxu1 %vm148_vm0, %v126_v33 }
  0x41   :  { %419 = vmatpush3.xpose.msk.msra.mxu1 %vm148_vm0, %v126_v33 }
  0x42   :  { %420 = vmatprep.subr.msk.mxu1 %vm148_vm0, %v125_v39 }
  0x45   :  { %421 = vmatpush3.xpose.msk.msra.mxu1 %vm148_vm0, %v125_v39 }
  0x7d   :  { %v24_v36 = vpop.permute.xlu0 %23 }
  0x7e   :  { %vm28_vm1 = vcmp.eq.s32.totalorder %v21_v35, %v24_v36 }
  0x7f   :  { %387 = vmatprep.mubr.msk.f32.mxu0 %vm28_vm1, %v454_v37 }
  0x81   :  { %v27_v38 = vpop.permute.xlu0 %26 }
  0x82   :  { %vm29_vm2 = vcmp.eq.s32.totalorder %v21_v35, %v27_v38 }
  0x83   :  { %388 = vmatmul.mubr.msk.f32.vlgmr.msra.gmra.mxu0 %vm29_vm2, %v454_v37 }
 0x143   :  { %v389_v40 = vpop.f32.mrf.mxu0 }
 0x145   :  { %v116_v41 = vpop.f32.mrf.mxu0 }
 0x146   :  { %422 = vmatprep.mubr.msk.f32.mxu1 %vm148_vm0, %v116_v41 }
 0x147   :  { %423 = vmatmul.mubr.msk.f32.vlgmr.msra.gmra.mxu1 %vm148_vm0, %v389_v40 }
 0x207   :  { %v424_v43 = vpop.f32.mrf.mxu1 }
 0x208   :  { %v275_v44 = vadd.f32 %v424_v43, %v300_v42 }
 0x209   :  { %v269_v45 = vpop.f32.mrf.mxu1 }
 0x20a   :  { %279 = vst [vmem:[#allocation2 + $0x8] sm:$0xff] %v275_v44  ;;  %v270_v46 = vadd.f32 %v300_v42, %v269_v45 }
 0x20c   :  { %278 = vst [vmem:[#allocation2] sm:$0xff] %v270_v46 }
 0x20d   :  { %442 = shalt.err (!%p439_p4)
}
 0x20e   :  { %s456_s0 = smov 128   ;;  %s457_s6 = smov 8  }
 0x20f   :  { %291 = dma.vmem_to_hbm [thread:$0]  %s286_s5, 256, %s629_s4, [#allocation3], %s456_s0, %s456_s0, %s457_s6  }
 0x210   :  { %451 = dma.done.wait [#allocation3], 256  }
 0x211   :  { %452 = vsyncadd [#allocation3], 4294967040 }
 0x212   :  { %295 = vsyncpa [#allocation3], 1 }

</bundles_post_ra>
